<compile_context>
chip_gen: v7x
topology: tpu7x:2x2x1
jax: 0.10.0
libtpu: 0.0.40
codegen_flags: <defaults>
</compile_context>

<pallas_src>
import functools
import math

import jax
import jax.numpy as jnp
from jax import lax
from jax.experimental import pallas as pl
from jax.experimental.pallas import tpu as pltpu


def _round_up(x, m):
    return (x + m - 1) // m * m


def _sublane_pack(dtype):
    # rows per packed vreg sublane group for this dtype
    return {4: 8, 2: 16, 1: 32}.get(jnp.dtype(dtype).itemsize, 8)


def _vmem_capacity_bytes():
    try:
        return int(pltpu.get_tpu_info().vmem_capacity_bytes)
    except Exception:
        return 64 * 1024 * 1024  # v7x floor; conservative for v5e/v6e (128 MiB)


# ---------------------------------------------------------------------------
# Kernels
# ---------------------------------------------------------------------------
def _onehot_kernel(ids_ref, emb_ref, out_ref, *, scale):
    # ids_ref: (T, 1) int32; emb_ref: (V_pad, D) VMEM-resident; out_ref: (T, D)
    ids = ids_ref[...]                                        # (T, 1)
    T = ids.shape[0]
    V = emb_ref.shape[0]
    col = lax.broadcasted_iota(jnp.int32, (T, V), 1)
    onehot = (col == ids).astype(emb_ref.dtype)               # exact row select, table dtype
    rows = jnp.dot(onehot, emb_ref[...], preferred_element_type=jnp.float32)
    out_ref[...] = (rows * scale).astype(out_ref.dtype)       # scale on VPU, in-kernel


def _gather_kernel(ids_smem, emb_ref, out_ref, *, scale, tile):
    # ids_smem: (N_pad,) int32 scalar-prefetched ids (SMEM)
    # emb_ref : (V, D) VMEM-resident table (single-buffered when large)
    # out_ref : (T, D) output tile
    base = pl.program_id(0) * tile

    def body(j, carry):
        token = ids_smem[base + j]
        row = emb_ref[pl.ds(token, 1), :]                     # (1, D) dynamic row read
        out_ref[pl.ds(j, 1), :] = (row * scale).astype(out_ref.dtype)
        return carry

    lax.fori_loop(0, tile, body, 0, unroll=False)
    # TODO(synk): group 8/16 rows per store (sublane-dense vst) if this path
    # ever shows up as store-slot bound.


def _stream_kernel(ids_smem, row_ref, out_ref, *, scale):
    # row_ref: (1, D) embedding row DMA'd from HBM for this token.
    del ids_smem
    out_ref[...] = (row_ref[...] * scale).astype(out_ref.dtype)


# ---------------------------------------------------------------------------
# Wrapper
# ---------------------------------------------------------------------------
def input_embedding(x, emb_table, *, max_tile=512):
    """x: (B, S) integer token ids; emb_table: (vocab, d_model)."""
    B, S = x.shape
    V, D = emb_table.shape
    N = B * S
    dtype = emb_table.dtype
    itemsize = jnp.dtype(dtype).itemsize
    scale = math.sqrt(D)
    pack = _sublane_pack(dtype)

    # Clamp out-of-range ids (padding ids etc.) -- matches jnp gather clamping.
    ids = jnp.clip(x.reshape(N).astype(jnp.int32), 0, V - 1)

    vmem_cap = _vmem_capacity_bytes()
    budget = int(vmem_cap * 0.7)          # headroom for compiler scratch

    # ---- path selection ----------------------------------------------------
    onehot_max_v = 2048 if dtype == jnp.bfloat16 else 1024
    use_onehot = V <= onehot_max_v
    V_pad = _round_up(V, 256) if use_onehot else V
    table_bytes = V_pad * D * itemsize
    # Single-buffer a large resident table (its block index never changes, so
    # there is nothing to pipeline); tiny tables keep default double-buffering.
    single_buffer = table_bytes > (8 << 20)
    table_buffers = 1 if single_buffer else 2
    table_kwargs = {"pipeline_mode": pl.Buffered(1)} if single_buffer else {}

    def tile_vmem_bytes(T):
        out_buf = 2 * T * D * itemsize                        # double-buffered output blocks
        if use_onehot:
            ids_buf = 2 * T * 128 * 4                         # (T,1) i32 block pads to (T,128)
            tmp = T * V_pad * itemsize + T * D * 4            # one-hot + f32 accumulator
        else:
            ids_buf = 0                                       # ids live in SMEM
            tmp = T * D * 4
        return out_buf + ids_buf + tmp

    resident = table_buffers * table_bytes + tile_vmem_bytes(pack) + (2 << 20) <= budget

    # =======================================================================
    # Path 3: table too big for VMEM -> stream one row per token from HBM.
    # =======================================================================
    if not resident:
        cost = pl.CostEstimate(
            flops=N * D, transcendentals=0,
            bytes_accessed=N * 4 + 2 * N * D * itemsize)
        out = pl.pallas_call(
            functools.partial(_stream_kernel, scale=scale),
            out_shape=jax.ShapeDtypeStruct((N, D), dtype),
            grid_spec=pltpu.PrefetchScalarGridSpec(
                num_scalar_prefetch=1,
                grid=(N,),
                in_specs=[pl.BlockSpec((pl.Element(1), D),
                                       lambda i, ids_smem: (ids_smem[i], 0))],
                out_specs=pl.BlockSpec((1, D), lambda i, ids_smem: (i, 0))),
            compiler_params=pltpu.CompilerParams(
                dimension_semantics=("arbitrary",)),
            cost_estimate=cost,
        )(ids, emb_table)
        # TODO(synk): batch several rows per grid step via a manual
        # make_async_copy gather (one row per step is DMA-descriptor/latency
        # bound, not HBM-bandwidth bound).
        return out.reshape(B, S, D)

    # ---- token tile size for the resident paths ---------------------------
    T = _round_up(min(max_tile, max(N, pack)), pack)
    while T > pack and table_buffers * table_bytes + tile_vmem_bytes(T) + (2 << 20) > budget:
        T = _round_up(max(T // 2, pack), pack)
    N_pad = _round_up(N, T)
    if N_pad != N:
        ids = jnp.pad(ids, (0, N_pad - N))        # id 0 is valid after clamping
    num_tiles = N_pad // T

    vmem_limit = table_buffers * table_bytes + tile_vmem_bytes(T) + (4 << 20)
    vmem_limit = max(vmem_limit, 16 << 20)
    vmem_limit = min(vmem_limit, int(vmem_cap * 0.9))

    # Megacore duplicates the resident-table DMA (and its VMEM copy) per core;
    # only worth it when token traffic dominates the table read.
    semantics = ("parallel",) if N_pad >= 4 * V_pad else ("arbitrary",)

    # =======================================================================
    # Path 1: small vocab -> one-hot matmul on the (otherwise idle) MXU.
    # =======================================================================
    if use_onehot:
        table = emb_table if V_pad == V else jnp.pad(
            emb_table, ((0, V_pad - V), (0, 0)))
        ids2d = ids.reshape(N_pad, 1)
        cost = pl.CostEstimate(
            flops=2 * N_pad * V_pad * D + N_pad * D, transcendentals=0,
            bytes_accessed=N_pad * 4 + V_pad * D * itemsize + N_pad * D * itemsize)
        out = pl.pallas_call(
            functools.partial(_onehot_kernel, scale=scale),
            out_shape=jax.ShapeDtypeStruct((N_pad, D), dtype),
            grid=(num_tiles,),
            in_specs=[
                pl.BlockSpec((T, 1), lambda t: (t, 0)),               # ids for this tile
                pl.BlockSpec((V_pad, D), lambda t: (0, 0), **table_kwargs),  # resident table
            ],
            out_specs=pl.BlockSpec((T, D), lambda t: (t, 0)),
            compiler_params=pltpu.CompilerParams(
                dimension_semantics=semantics,
                vmem_limit_bytes=vmem_limit),
            cost_estimate=cost,
        )(ids2d, table)
        return out[:N].reshape(B, S, D)

    # =======================================================================
    # Path 2: larger vocab, table still fits VMEM -> SMEM-ids row gather.
    # =======================================================================
    # TODO(synk): for very long sequences (N beyond ~256K tokens) the scalar-
    # prefetched ids overflow SMEM; chunk the call or move ids to per-tile
    # SMEM blocks.
    cost = pl.CostEstimate(
        flops=N_pad * D, transcendentals=0,
        bytes_accessed=N_pad * 4 + V_pad * D * itemsize + N_pad * D * itemsize)
    out = pl.pallas_call(
        functools.partial(_gather_kernel, scale=scale, tile=T),
        out_shape=jax.ShapeDtypeStruct((N_pad, D), dtype),
        grid_spec=pltpu.PrefetchScalarGridSpec(
            num_scalar_prefetch=1,
            grid=(num_tiles,),
            in_specs=[pl.BlockSpec((V_pad, D), lambda t, ids_smem: (0, 0),
                                   **table_kwargs)],
            out_specs=pl.BlockSpec((T, D), lambda t, ids_smem: (t, 0))),
        compiler_params=pltpu.CompilerParams(
            dimension_semantics=semantics,
            vmem_limit_bytes=vmem_limit),
        cost_estimate=cost,
    )(ids, emb_table)
    return out[:N].reshape(B, S, D)


if __name__ == "__main__":
    # Small shapes consistent with the module: vocab=64, d_model=128, B=2, S=8.
    d_model = 128
    vocab_size = 64
    B, S = 2, 8

    key = jax.random.PRNGKey(0)
    k_emb, k_ids = jax.random.split(key)

    # nn.Embedding default init: weight ~ N(0, 1), float32.
    emb_table = jax.random.normal(k_emb, (vocab_size, d_model), dtype=jnp.float32)
    x = jax.random.randint(k_ids, (B, S), 0, vocab_size, dtype=jnp.int32)

    out = input_embedding(x, emb_table)
    out = jax.block_until_ready(out)

    # Reference check (plain JAX).
    ref = emb_table[x] * math.sqrt(d_model)
    assert out.shape == (B, S, d_model)
    assert jnp.allclose(out, ref, atol=1e-5, rtol=1e-5)

    print("KERNEL_OK")
</pallas_src>

<mosaic_0001>
module attributes {stable_mosaic.version = 11 : i64} {
  func.func @_onehot_kernel(%arg0: i32, %arg1: memref<16x1xi32, #tpu.memory_space<vmem>>, %arg2: memref<256x128xf32, #tpu.memory_space<vmem>>, %arg3: memref<16x128xf32, #tpu.memory_space<vmem>>) attributes {dimension_semantics = [#tpu.dimension_semantics<arbitrary>], iteration_bounds = array<i64: 1>, scalar_prefetch = 0 : i64, scratch_operands = 0 : i64, tpu.core_type = #tpu.core_type<tc>, window_params = [{transform_indices = @transform_0, window_bounds = array<i64: 16, 1>}, {pipeline_mode = #tpu.pipeline_mode<synchronous>, transform_indices = @transform_1, window_bounds = array<i64: 256, 128>}, {transform_indices = @transform_2, window_bounds = array<i64: 16, 128>}]} {
    %c0 = arith.constant 0 : index
    %c0_0 = arith.constant 0 : index
    %0 = vector.load %arg1[%c0, %c0_0] : memref<16x1xi32, #tpu.memory_space<vmem>>, vector<16x1xi32>
    %1 = tpu.iota {dimensions = array<i32: 1>} : vector<16x256xi32>
    %2 = vector.broadcast %0 : vector<16x1xi32> to vector<16x256xi32>
    %3 = arith.cmpi eq, %1, %2 : vector<16x256xi32>
    %4 = arith.extui %3 : vector<16x256xi1> to vector<16x256xi32>
    %5 = arith.sitofp %4 : vector<16x256xi32> to vector<16x256xf32>
    %c0_1 = arith.constant 0 : index
    %c0_2 = arith.constant 0 : index
    %6 = vector.load %arg2[%c0_1, %c0_2] : memref<256x128xf32, #tpu.memory_space<vmem>>, vector<256x128xf32>
    %cst = arith.constant dense<0.000000e+00> : vector<16x128xf32>
    %7 = tpu.matmul %5, %6, %cst {dimension_numbers = #tpu.dot_dimension_numbers<[1], [0], [0], [1], [0, 0, 1, 1], [], []>} : vector<16x256xf32>, vector<256x128xf32>, vector<16x128xf32> -> vector<16x128xf32>
    %cst_3 = arith.constant 11.3137083 : f32
    %8 = vector.broadcast %cst_3 : f32 to vector<16x128xf32>
    %9 = arith.mulf %7, %8 : vector<16x128xf32>
    %c0_4 = arith.constant 0 : index
    %c0_5 = arith.constant 0 : index
    %10 = vector.load %arg3[%c0_4, %c0_5] : memref<16x128xf32, #tpu.memory_space<vmem>>, vector<16x128xf32>
    tpu.vector_store %arg3[%c0_4, %c0_5], %9 {strides = array<i32>} : memref<16x128xf32, #tpu.memory_space<vmem>>, vector<16x128xf32>,
    return
  }
  func.func @transform_0(%arg0: i32) -> (i32, i32) {
    %c0_i32 = arith.constant 0 : i32
    %c0_i32_0 = arith.constant 0 : i32
    return %arg0, %c0_i32 : i32, i32
  }
  func.func @transform_1(%arg0: i32) -> (i32, i32) {
    %c0_i32 = arith.constant 0 : i32
    %c0_i32_0 = arith.constant 0 : i32
    %c0_i32_1 = arith.constant 0 : i32
    return %c0_i32, %c0_i32_0 : i32, i32
  }
  func.func @transform_2(%arg0: i32) -> (i32, i32) {
    %c0_i32 = arith.constant 0 : i32
    %c0_i32_0 = arith.constant 0 : i32
    return %arg0, %c0_i32 : i32, i32
  }
}

</mosaic_0001>

<bundles_post_ra>
// kernel: tpu_custom_call.1
= control target key start
LH: loop header
LB: loop body
LE: loop exit
PB: predicated region body
PF: predicated region fallthrough
CT: control target
= control target key end

     0   :  { %7 = vsyncpa [#allocation3], 0  ;;  %s383_s0 = inlined_call_operand.vmem [shape: s32[16,1], index: 0, kind: input, shape index: {}]   ;;  %s384_s1 = inlined_call_operand.hbm [shape: f32[256,128], index: 1, kind: input, shape index: {}]   ;;  %s385_s2 = inlined_call_operand.hbm [shape: f32[16,128], index: 2, kind: output, shape index: {}]  }
   0x1   :  { %8 = vsyncpa [#allocation4], 0  ;;  %s326_s9 = smov [#allocation2]   ;;  %s278_s13 = scalar_lea.hbm %s384_s1, 4096 }
   0x2   :  { %s16_s10 = sshll.u32 %s326_s9, 4  ;;  %p279_p0 = scmp.ne.s32.totalorder %s384_s1, %s278_s13  ;;  %s17_s10 = int_to_ptr.vmem [resolvable:$true] %s16_s10 }
   0x3   :  { %p282_p1 = scmp.lt.u32.totalorder %s278_s13, %s384_s1 }
   0x5   :  { %p284_p2 = pnand %p282_p1, %p279_p0 }
   0x7   :  { %287 = shalt.err (!%p284_p2)
}
   0x8   :  { %s288_s18 = scalar_lea.vmem %s17_s10, 4096  ;;  %p293_p4 = scmp.lt.s32.totalorder %s17_s10, %s17_s10 }
   0x9   :  { %p289_p3 = scmp.ne.s32.totalorder %s17_s10, %s288_s18  ;;  %p294_p5 = scmp.lt.s32.totalorder %s288_s18, %s288_s18 }
   0xb   :  { %p295_p6 = por %p294_p5, %p293_p4 }
   0xd   :  { %p296_p7 = pnand %p295_p6, %p289_p3 }
   0xf   :  { %299 = shalt.err (!%p296_p7)
}
  0x10   :  { %s327_s19 = smov 128   ;;  %s328_s20 = smov 8  }
  0x11   :  { %22 = dma.hbm_to_vmem [thread:$0]  %s384_s1, 4096, %s17_s10, [#allocation3], %s327_s19, %s327_s19, %s328_s20  }
  0x12   :  { %322 = dma.done.wait [#allocation3], 4096  }
  0x13   :  { %323 = vsyncadd [#allocation3], 4294963200  ;;  %v329_v0 = vmov 0   ;;  %v26_v1 = vld [vmem:[%s383_s0] sm:$0xff]  ;;  %v27_v2 = vld [vmem:[%s383_s0 + $0x8] sm:$0xff]  ;;  %v28_v51 = vlaneseq  ;;  %v330_v55 = vmov 1.0  }
  0x14   :  { %277 = vset.pattern.permute.xlu0 %v329_v0  ;;  %v65_v3 = vld [vmem:[#allocation2 + $0x80] sm:$0xff]  ;;  %v66_v4 = vld [vmem:[#allocation2 + $0x88] sm:$0xff]  ;;  %v67_v9 = vld [vmem:[#allocation2 + $0x90] sm:$0xff]  ;;  %s331_s0 = smov [#allocation5]  }
  0x15   :  { %32 = vperm.xlu0 %277, %v26_v1   ;;  %v49_v5 = vld [vmem:[#allocation2] sm:$0xff]  ;;  %v50_v6 = vld [vmem:[#allocation2 + $0x8] sm:$0xff]  ;;  %v223_v7 = vpack.c.bf16 %v66_v4, %v65_v3  ;;  %v68_v10 = vld [vmem:[#allocation2 + $0x98] sm:$0xff]  ;;  %v29_v52 = vand.u32 127, %v28_v51  ;;  %s165_s1 = sshll.u32 %s331_s0, 4  ;;  %s166_s1 = int_to_ptr.vmem [resolvable:$true] %s165_s1 }
  0x16   :  { %v225_v8 = vpack.c.bf16 %v50_v6, %v49_v5  ;;  %v51_v11 = vld [vmem:[#allocation2 + $0x10] sm:$0xff]  ;;  %v227_v12 = vpack.c.bf16 %v68_v10, %v67_v9  ;;  %v52_v13 = vld [vmem:[#allocation2 + $0x18] sm:$0xff]  ;;  %v69_v14 = vld [vmem:[#allocation2 + $0xa0] sm:$0xff]  ;;  %s300_s27 = scalar_lea.vmem %s166_s1, 256  ;;  %p305_p9 = scmp.lt.s32.totalorder %s166_s1, %s166_s1 }
  0x17   :  { %v70_v15 = vld [vmem:[#allocation2 + $0xa8] sm:$0xff]  ;;  %224 = vmatprep.subr.bf16.mxu0 %v223_v7  ;;  %255 = vmatprep.subr.bf16.mxu1 %v223_v7  ;;  %v229_v16 = vpack.c.bf16 %v52_v13, %v51_v11  ;;  %v53_v18 = vld [vmem:[#allocation2 + $0x20] sm:$0xff]  ;;  %v71_v20 = vld [vmem:[#allocation2 + $0xb0] sm:$0xff]  ;;  %v30_v53 = vadd.s32 128, %v29_v52  ;;  %p301_p8 = scmp.ne.s32.totalorder %s166_s1, %s300_s27  ;;  %p306_p10 = scmp.lt.s32.totalorder %s300_s27, %s300_s27 }
  0x18   :  { %226 = vmatpush3.bf16.msra.mxu0 %v225_v8  ;;  %263 = vmatpush3.bf16.msra.mxu1 %v225_v8  ;;  %v231_v17 = vpack.c.bf16 %v70_v15, %v69_v14  ;;  %v54_v19 = vld [vmem:[#allocation2 + $0x28] sm:$0xff]  ;;  %v72_v21 = vld [vmem:[#allocation2 + $0xb8] sm:$0xff]  ;;  %v55_v24 = vld [vmem:[#allocation2 + $0x30] sm:$0xff] }
  0x19   :  { %35 = vperm.xlu0 %277, %v27_v2   ;;  %228 = vmatprep.subr.bf16.mxu0 %v227_v12  ;;  %v233_v22 = vpack.c.bf16 %v54_v19, %v53_v18  ;;  %v235_v23 = vpack.c.bf16 %v72_v21, %v71_v20  ;;  %v56_v25 = vld [vmem:[#allocation2 + $0x38] sm:$0xff]  ;;  %v73_v26 = vld [vmem:[#allocation2 + $0xc0] sm:$0xff]  ;;  %v74_v27 = vld [vmem:[#allocation2 + $0xc8] sm:$0xff]  ;;  %p307_p11 = por %p306_p10, %p305_p9 }
  0x1a   :  { %256 = vmatprep.subr.bf16.mxu1 %v227_v12  ;;  %v237_v28 = vpack.c.bf16 %v56_v25, %v55_v24  ;;  %v239_v29 = vpack.c.bf16 %v74_v27, %v73_v26  ;;  %v57_v30 = vld [vmem:[#allocation2 + $0x40] sm:$0xff]  ;;  %v58_v31 = vld [vmem:[#allocation2 + $0x48] sm:$0xff]  ;;  %v75_v32 = vld [vmem:[#allocation2 + $0xd0] sm:$0xff] }
  0x1b   :  { %v76_v33 = vld [vmem:[#allocation2 + $0xd8] sm:$0xff]  ;;  %v241_v34 = vpack.c.bf16 %v58_v31, %v57_v30  ;;  %v59_v36 = vld [vmem:[#allocation2 + $0x50] sm:$0xff]  ;;  %v77_v38 = vld [vmem:[#allocation2 + $0xe0] sm:$0xff]  ;;  %p308_p12 = pnand %p307_p11, %p301_p8 }
  0x1c   :  { %230 = vmatpush3.bf16.msra.mxu0 %v229_v16  ;;  %264 = vmatpush3.bf16.msra.mxu1 %v229_v16  ;;  %v243_v35 = vpack.c.bf16 %v76_v33, %v75_v32  ;;  %v60_v37 = vld [vmem:[#allocation2 + $0x58] sm:$0xff]  ;;  %v78_v39 = vld [vmem:[#allocation2 + $0xe8] sm:$0xff]  ;;  %v61_v42 = vld [vmem:[#allocation2 + $0x60] sm:$0xff] }
  0x1d   :  { %232 = vmatprep.subr.bf16.mxu0 %v231_v17  ;;  %257 = vmatprep.subr.bf16.mxu1 %v231_v17  ;;  %v245_v40 = vpack.c.bf16 %v60_v37, %v59_v36  ;;  %v247_v41 = vpack.c.bf16 %v78_v39, %v77_v38  ;;  %v62_v43 = vld [vmem:[#allocation2 + $0x68] sm:$0xff]  ;;  %v79_v44 = vld [vmem:[#allocation2 + $0xf0] sm:$0xff]  ;;  %v80_v45 = vld [vmem:[#allocation2 + $0xf8] sm:$0xff] }
  0x1e   :  { %v249_v46 = vpack.c.bf16 %v62_v43, %v61_v42  ;;  %v251_v47 = vpack.c.bf16 %v80_v45, %v79_v44  ;;  %v63_v48 = vld [vmem:[#allocation2 + $0x70] sm:$0xff]  ;;  %v64_v49 = vld [vmem:[#allocation2 + $0x78] sm:$0xff] }
  0x1f   :  { %v253_v50 = vpack.c.bf16 %v64_v49, %v63_v48 }
  0x20   :  { %234 = vmatpush3.bf16.msra.mxu0 %v233_v22  ;;  %265 = vmatpush3.bf16.msra.mxu1 %v233_v22 }
  0x21   :  { %236 = vmatprep.subr.bf16.mxu0 %v235_v23  ;;  %258 = vmatprep.subr.bf16.mxu1 %v235_v23 }
  0x24   :  { %238 = vmatpush3.bf16.msra.mxu0 %v237_v28  ;;  %266 = vmatpush3.bf16.msra.mxu1 %v237_v28 }
  0x25   :  { %240 = vmatprep.subr.bf16.mxu0 %v239_v29  ;;  %259 = vmatprep.subr.bf16.mxu1 %v239_v29 }
  0x28   :  { %242 = vmatpush3.bf16.msra.mxu0 %v241_v34  ;;  %267 = vmatpush3.bf16.msra.mxu1 %v241_v34 }
  0x29   :  { %244 = vmatprep.subr.bf16.mxu0 %v243_v35  ;;  %260 = vmatprep.subr.bf16.mxu1 %v243_v35 }
  0x2c   :  { %246 = vmatpush3.bf16.msra.mxu0 %v245_v40  ;;  %268 = vmatpush3.bf16.msra.mxu1 %v245_v40 }
  0x2d   :  { %248 = vmatprep.subr.bf16.mxu0 %v247_v41  ;;  %261 = vmatprep.subr.bf16.mxu1 %v247_v41 }
  0x30   :  { %250 = vmatpush3.bf16.msra.mxu0 %v249_v46  ;;  %269 = vmatpush3.bf16.msra.mxu1 %v249_v46 }
  0x31   :  { %252 = vmatprep.subr.bf16.mxu0 %v251_v47  ;;  %262 = vmatprep.subr.bf16.mxu1 %v251_v47 }
  0x34   :  { %254 = vmatpush3.bf16.msra.mxu0 %v253_v50  ;;  %270 = vmatpush3.bf16.msra.mxu1 %v253_v50 }
  0x94   :  { %v33_v54 = vpop.permute.xlu0 %32 }
  0x95   :  { %vm37_vm0 = vcmp.eq.s32.totalorder %v29_v52, %v33_v54  ;;  %vm38_vm1 = vcmp.eq.s32.totalorder %v30_v53, %v33_v54 }
  0x96   :  { %181 = vmatprep.mubr.msk.f32.mxu0 %vm38_vm1, %v330_v55 }
  0x97   :  { %182 = vmatmul.mubr.msk.f32.vlgmr.msra.gmra.mrb[0].mxu0 %vm37_vm0, %v330_v55 }
  0x98   :  { %v36_v56 = vpop.permute.xlu0 %35 }
  0x99   :  { %vm39_vm2 = vcmp.eq.s32.totalorder %v29_v52, %v36_v56  ;;  %vm40_vm3 = vcmp.eq.s32.totalorder %v30_v53, %v36_v56 }
  0x9a   :  { %183 = vmatprep.mubr.msk.f32.mxu1 %vm40_vm3, %v330_v55 }
  0x9b   :  { %184 = vmatmul.mubr.msk.f32.vlgmr.msra.gmra.mrb[0].mxu1 %vm39_vm2, %v330_v55 }
 0x16a   :  { %v217_v57 = vpop.f32.mrb[0].mxu0 }
 0x16b   :  { %v218_v58 = vpop.f32.mrb[1].mxu0 }
 0x16c   :  { %v219_v59 = vadd.f32 %v218_v58, %v217_v57 }
 0x16e   :  { %v156_v60 = vmul.f32 11.313708, %v219_v59  ;;  %v220_v61 = vpop.f32.mrb[0].mxu1 }
 0x16f   :  { %v221_v62 = vpop.f32.mrb[1].mxu1 }
 0x170   :  { %158 = vst [vmem:[#allocation5] sm:$0xff] %v156_v60  ;;  %v222_v63 = vadd.f32 %v221_v62, %v220_v61 }
 0x172   :  { %v157_v0 = vmul.f32 11.313708, %v222_v63 }
 0x174   :  { %159 = vst [vmem:[#allocation5 + $0x8] sm:$0xff] %v157_v0 }
 0x175   :  { %311 = shalt.err (!%p308_p12)
}
 0x176   :  { %s312_s30 = scalar_lea.hbm %s385_s2, 256 }
 0x177   :  { %p313_p13 = scmp.ne.s32.totalorder %s385_s2, %s312_s30  ;;  %p316_p0 = scmp.lt.u32.totalorder %s312_s30, %s385_s2 }
 0x179   :  { %p318_p1 = pnand %p316_p0, %p313_p13 }
 0x17b   :  { %321 = shalt.err (!%p318_p1)
}
 0x17c   :  { %171 = dma.vmem_to_hbm [thread:$0]  %s166_s1, 256, %s385_s2, [#allocation4], %s327_s19, %s327_s19, %s328_s20  }
 0x17d   :  { %324 = dma.done.wait [#allocation4], 256  }
 0x17e   :  { %325 = vsyncadd [#allocation4], 4294967040 }
 0x17f   :  { %175 = vsyncpa [#allocation3], 1 }
 0x180   :  { %176 = vsyncpa [#allocation4], 1 }

</bundles_post_ra>
